<compile_context>
chip_gen: v6e
topology: v6e:2x2x1
jax: 0.10.0
libtpu: 0.0.40
codegen_flags: <defaults>
</compile_context>

<pallas_src>
import functools

import jax
import jax.numpy as jnp
from jax.experimental import pallas as pl
from jax.experimental.pallas import tpu as pltpu

hidden_size = 15
input_size = 8
output_size = 1

LANE = 128      # vreg lane width
SUBLANE = 8     # f32 sublane count


def _round_up(n, m):
    return (n + m - 1) // m * m


def mlp_kernel(x_ref, w1_ref, b1_ref, w2_ref, b2_ref, o_ref):
    # x_ref:  (TB, K)   batch on sublanes, input features on lanes
    # w1_ref: (K, Hp)   hidden padded to 128 lanes (grid-resident)
    # b1_ref: (1, Hp)
    # w2_ref: (1, Hp)   fc2's single output column, padded, laid on lanes
    # b2_ref: (1, 1)
    # o_ref:  (TB, 1)
    x = x_ref[...]
    h = jnp.dot(x, w1_ref[...], preferred_element_type=jnp.float32)
    h = jnp.maximum(h + b1_ref[...], 0.0)              # ReLU; padded cols stay 0
    # fc2 with output_size == 1: VPU multiply + lane reduce instead of an MXU
    # matmul into a 128-wide padded slab (padded hidden lanes contribute 0).
    y = jnp.sum(h * w2_ref[...], axis=-1, keepdims=True)   # (TB, 1)
    o_ref[...] = (y + b2_ref[...]).astype(o_ref.dtype)


@functools.partial(jax.jit, static_argnames=("block_batch",))
def mlp_forward(x, w1p, b1p, w2p, b2p, block_batch=512):
    """x: (B, input_size) f32.  w1p/b1p/w2p/b2p are the *pre-padded* params from
    pad_params().  Returns (B, 1) float32."""
    B, K = x.shape
    Hp = w1p.shape[1]

    # Batch tile: multiple of 8 sublanes, capped by block_batch (default 512 so
    # per-step overhead is amortized); pad B up to a multiple of the tile.
    TB = _round_up(min(block_batch, B), SUBLANE)
    Bp = _round_up(B, TB)
    xp = x.astype(jnp.float32)
    if Bp != B:
        xp = jnp.zeros((Bp, K), jnp.float32).at[:B].set(xp)

    grid = (Bp // TB,)
    out = pl.pallas_call(
        mlp_kernel,
        out_shape=jax.ShapeDtypeStruct((Bp, 1), jnp.float32),
        grid=grid,
        in_specs=[
            pl.BlockSpec((TB, K), lambda i: (i, 0)),    # x tile per grid step
            pl.BlockSpec((K, Hp), lambda i: (0, 0)),    # weights stay VMEM-resident
            pl.BlockSpec((1, Hp), lambda i: (0, 0)),
            pl.BlockSpec((1, Hp), lambda i: (0, 0)),
            pl.BlockSpec((1, 1), lambda i: (0, 0)),
        ],
        out_specs=pl.BlockSpec((TB, 1), lambda i: (i, 0)),
        compiler_params=pltpu.CompilerParams(
            dimension_semantics=("parallel",),
        ),
    )(xp, w1p, b1p, w2p, b2p)

    # Only batch padding (if any) to drop; output is already (Bp, 1).
    return out[:B]


def pad_params(w1, b1, w2, b2):
    """One-time padding of parameters to lane-dense shapes (done at init, NOT
    per forward call).  Zero padding keeps padded hidden units inert through
    bias + ReLU + fc2."""
    K, H = w1.shape
    O = w2.shape[1]
    assert O == 1, "kernel is specialized for output_size == 1"
    Hp = _round_up(H, LANE)
    w1p = jnp.zeros((K, Hp), jnp.float32).at[:, :H].set(w1.astype(jnp.float32))
    b1p = jnp.zeros((1, Hp), jnp.float32).at[:, :H].set(
        b1.astype(jnp.float32).reshape(1, H))
    w2p = jnp.zeros((1, Hp), jnp.float32).at[:, :H].set(
        w2.astype(jnp.float32).reshape(H, 1).T)      # fc2 column as a lane row
    b2p = b2.astype(jnp.float32).reshape(1, 1)
    return w1p, b1p, w2p, b2p


def init_params(key):
    # Deterministic init mimicking nn.Linear's uniform(-1/sqrt(fan_in), 1/sqrt(fan_in)).
    k1, k2, k3, k4 = jax.random.split(key, 4)
    lim1 = 1.0 / jnp.sqrt(jnp.float32(input_size))
    lim2 = 1.0 / jnp.sqrt(jnp.float32(hidden_size))
    # Stored as (in, out): x @ W == PyTorch's x @ W.T with W of shape (out, in).
    w1 = jax.random.uniform(k1, (input_size, hidden_size), jnp.float32, -lim1, lim1)
    b1 = jax.random.uniform(k2, (1, hidden_size), jnp.float32, -lim1, lim1)
    w2 = jax.random.uniform(k3, (hidden_size, output_size), jnp.float32, -lim2, lim2)
    b2 = jax.random.uniform(k4, (1, output_size), jnp.float32, -lim2, lim2)
    return w1, b1, w2, b2


if __name__ == "__main__":
    key = jax.random.PRNGKey(0)
    kx, kp = jax.random.split(key)

    # batch=1024 with the default TB=512 -> grid=(2,): exercises the batch-tiled
    # path and keeps both v7x TensorCores busy.
    batch = 1024
    x = jax.random.normal(kx, (batch, input_size), jnp.float32)
    w1, b1, w2, b2 = init_params(kp)
    # Pad once at init (hoisted out of the per-call path).
    w1p, b1p, w2p, b2p = pad_params(w1, b1, w2, b2)
    w1p, b1p, w2p, b2p = jax.block_until_ready((w1p, b1p, w2p, b2p))

    out = mlp_forward(x, w1p, b1p, w2p, b2p)
    out = jax.block_until_ready(out)

    # Pure-JAX reference check of the same math.
    ref = jnp.maximum(x @ w1 + b1, 0.0) @ w2 + b2
    assert out.shape == (batch, output_size)
    assert jnp.allclose(out, ref, atol=1e-5, rtol=1e-5)

    print("KERNEL_OK")
</pallas_src>

<mosaic_0001>
module attributes {stable_mosaic.version = 11 : i64} {
  func.func @mlp_kernel(%arg0: i32, %arg1: memref<512x8xf32, #tpu.memory_space<vmem>>, %arg2: memref<8x128xf32, #tpu.memory_space<vmem>>, %arg3: memref<1x128xf32, #tpu.memory_space<vmem>>, %arg4: memref<1x128xf32, #tpu.memory_space<vmem>>, %arg5: memref<1x1xf32, #tpu.memory_space<vmem>>, %arg6: memref<512x1xf32, #tpu.memory_space<vmem>>) attributes {dimension_semantics = [#tpu.dimension_semantics<parallel>], iteration_bounds = array<i64: 2>, scalar_prefetch = 0 : i64, scratch_operands = 0 : i64, tpu.core_type = #tpu.core_type<tc>, window_params = [{transform_indices = @transform_0, window_bounds = array<i64: 512, 8>}, {pipeline_mode = #tpu.pipeline_mode<synchronous>, transform_indices = @transform_1, window_bounds = array<i64: 8, 128>}, {pipeline_mode = #tpu.pipeline_mode<synchronous>, transform_indices = @transform_2, window_bounds = array<i64: 1, 128>}, {pipeline_mode = #tpu.pipeline_mode<synchronous>, transform_indices = @transform_3, window_bounds = array<i64: 1, 128>}, {pipeline_mode = #tpu.pipeline_mode<synchronous>, transform_indices = @transform_4, window_bounds = array<i64: 1, 1>}, {transform_indices = @transform_5, window_bounds = array<i64: 512, 1>}]} {
    %c0 = arith.constant 0 : index
    %c0_0 = arith.constant 0 : index
    %0 = vector.load %arg1[%c0, %c0_0] : memref<512x8xf32, #tpu.memory_space<vmem>>, vector<512x8xf32>
    %c0_1 = arith.constant 0 : index
    %c0_2 = arith.constant 0 : index
    %1 = vector.load %arg2[%c0_1, %c0_2] : memref<8x128xf32, #tpu.memory_space<vmem>>, vector<8x128xf32>
    %cst = arith.constant dense<0.000000e+00> : vector<512x128xf32>
    %2 = tpu.matmul %0, %1, %cst {dimension_numbers = #tpu.dot_dimension_numbers<[1], [0], [0], [1], [0, 0, 1, 1], [], []>} : vector<512x8xf32>, vector<8x128xf32>, vector<512x128xf32> -> vector<512x128xf32>
    %c0_3 = arith.constant 0 : index
    %c0_4 = arith.constant 0 : index
    %3 = vector.load %arg3[%c0_3, %c0_4] : memref<1x128xf32, #tpu.memory_space<vmem>>, vector<1x128xf32>
    %4 = vector.broadcast %3 : vector<1x128xf32> to vector<512x128xf32>
    %5 = arith.addf %2, %4 : vector<512x128xf32>
    %cst_5 = arith.constant 0.000000e+00 : f32
    %6 = vector.broadcast %cst_5 : f32 to vector<512x128xf32>
    %7 = arith.maximumf %5, %6 : vector<512x128xf32>
    %c0_6 = arith.constant 0 : index
    %c0_7 = arith.constant 0 : index
    %8 = vector.load %arg4[%c0_6, %c0_7] : memref<1x128xf32, #tpu.memory_space<vmem>>, vector<1x128xf32>
    %9 = vector.broadcast %8 : vector<1x128xf32> to vector<512x128xf32>
    %10 = arith.mulf %7, %9 : vector<512x128xf32>
    %cst_8 = arith.constant dense<0.000000e+00> : vector<512xf32>
    %11 = vector.multi_reduction <add>, %10, %cst_8 [1] : vector<512x128xf32> to vector<512xf32>
    %12 = vector.shape_cast %11 : vector<512xf32> to vector<512x1xf32>
    %c0_9 = arith.constant 0 : index
    %c0_10 = arith.constant 0 : index
    %13 = vector.load %arg5[%c0_9, %c0_10] : memref<1x1xf32, #tpu.memory_space<vmem>>, vector<1x1xf32>
    %14 = vector.broadcast %13 : vector<1x1xf32> to vector<512x1xf32>
    %15 = arith.addf %12, %14 : vector<512x1xf32>
    %c0_11 = arith.constant 0 : index
    %c0_12 = arith.constant 0 : index
    %16 = vector.load %arg6[%c0_11, %c0_12] : memref<512x1xf32, #tpu.memory_space<vmem>>, vector<512x1xf32>
    tpu.vector_store %arg6[%c0_11, %c0_12], %15 {strides = array<i32>} : memref<512x1xf32, #tpu.memory_space<vmem>>, vector<512x1xf32>,
    return
  }
  func.func @transform_0(%arg0: i32) -> (i32, i32) {
    %c0_i32 = arith.constant 0 : i32
    %c0_i32_0 = arith.constant 0 : i32
    return %arg0, %c0_i32 : i32, i32
  }
  func.func @transform_1(%arg0: i32) -> (i32, i32) {
    %c0_i32 = arith.constant 0 : i32
    %c0_i32_0 = arith.constant 0 : i32
    %c0_i32_1 = arith.constant 0 : i32
    return %c0_i32, %c0_i32_0 : i32, i32
  }
  func.func @transform_2(%arg0: i32) -> (i32, i32) {
    %c0_i32 = arith.constant 0 : i32
    %c0_i32_0 = arith.constant 0 : i32
    %c0_i32_1 = arith.constant 0 : i32
    return %c0_i32, %c0_i32_0 : i32, i32
  }
  func.func @transform_3(%arg0: i32) -> (i32, i32) {
    %c0_i32 = arith.constant 0 : i32
    %c0_i32_0 = arith.constant 0 : i32
    %c0_i32_1 = arith.constant 0 : i32
    return %c0_i32, %c0_i32_0 : i32, i32
  }
  func.func @transform_4(%arg0: i32) -> (i32, i32) {
    %c0_i32 = arith.constant 0 : i32
    %c0_i32_0 = arith.constant 0 : i32
    %c0_i32_1 = arith.constant 0 : i32
    return %c0_i32, %c0_i32_0 : i32, i32
  }
  func.func @transform_5(%arg0: i32) -> (i32, i32) {
    %c0_i32 = arith.constant 0 : i32
    %c0_i32_0 = arith.constant 0 : i32
    return %arg0, %c0_i32 : i32, i32
  }
}

</mosaic_0001>

<bundles_post_ra>
// kernel: mlp_forward.1
= control target key start
LH: loop header
LB: loop body
LE: loop exit
PB: predicated region body
PF: predicated region fallthrough
CT: control target
= control target key end

     0   :  { %s1627_s20 = smov 0   ;;  %s2229_s0 = inlined_call_operand.vmem [shape: f32[1024,8], index: 0, kind: input, shape index: {}]   ;;  %s2230_s1 = inlined_call_operand.vmem [shape: f32[8,128], index: 1, kind: input, shape index: {}]   ;;  %s2231_s2 = inlined_call_operand.vmem [shape: f32[1,128], index: 2, kind: input, shape index: {}]   ;;  %s2232_s3 = inlined_call_operand.vmem [shape: f32[1,128], index: 3, kind: input, shape index: {}]   ;;  %s2233_s4 = inlined_call_operand.<no memory space> [shape: f32[1,1], index: 4, kind: input, shape index: {}]   ;;  %s2234_s5 = inlined_call_operand.vmem [shape: f32[1024,1], index: 5, kind: output, shape index: {}]  }
   0x1   :  { %v10_v0 = vstv %s2233_s4 }
   0x2   :  { %11 = vst [vmem:[#allocation2] sm:$0x1] %v10_v0 }
   0x3 LB: > { %s1335_s21 = sadd.s32 4294967295, %s1592_s20   ;;  %p1339_p0 = scmp.ge.s32.totalorder %s1592_s20, 1  ;;  %s1592_s20 = sphi %s1627_s20, %s17_s20  }
   0x4   : > { %p190_p1 = scmp.lt.s32.totalorder %s1592_s20, 3 }
   0x6   : > { %p191_p2 = pnand %p1339_p0, %p190_p1 }
   0x7   : > { %s1340_s4 = sshll.u32 (!%p191_p2), %s1335_s21, 6 }
   0x8   : > { %194 = sbr.rel (%p191_p2) target bundleno = 483 (0x1e3), region = 40  ;;  %p219_p3 = scmp.lt.s32.totalorder (!%p191_p2), %s1340_s4, 127 }
   0xd   : > { %v294_v1 = vld [vmem:[%s2230_s1] sm:$0xff]  ;;  %s2236_s4 = smov (!%p219_p3, %s1340_s4), 127  ;;  %vm302_vm0 = vcmask 64512   ;;  %vm1214_vm1 = vcmask 7168  }
   0xe   : > { %1478 = vmatprep.subr.mxu0 %v294_v1  ;;  %1576 = vmatprep.subr.mxu1 %v294_v1  ;;  %s1341_s24 = sshll.u32 %s2236_s4, 3 }
   0xf   : > { %1479 = vmatpush3.msra.mxu0 %v294_v1  ;;  %1577 = vmatpush3.msra.mxu1 %v294_v1  ;;  %s1646_s27 = scalar_lea.vmem %s2229_s0, %s1341_s24  ;;  %s2032_s9 = scalar_lea.vmem %s2234_s5, %s1341_s24 }
  0x10   : > { %v230_v2 = vld [vmem:[%s1646_s27] sm:$0xff]  ;;  %v231_v4 = vld [vmem:[%s1646_s27 + $0x8] sm:$0xff]  ;;  %v232_v6 = vld [vmem:[%s1646_s27 + $0x10] sm:$0xff] }
  0x11   : > { %v262_v3 = vld [vmem:[%s1646_s27 + $0x100] sm:$0xff]  ;;  %1480 = vmatprep.mubr.msk.f32.mxu0 %vm302_vm0, %v230_v2  ;;  %v263_v5 = vld [vmem:[%s1646_s27 + $0x108] sm:$0xff]  ;;  %v264_v7 = vld [vmem:[%s1646_s27 + $0x110] sm:$0xff] }
  0x12   : > { %1528 = vmatprep.mubr.msk.f32.mxu1 %vm302_vm0, %v262_v3  ;;  %1481 = vmatmul.mubr.msk.f32.vlgmr.msra.gmra.mxu0 %vm302_vm0, %v231_v4  ;;  %v233_v8 = vld [vmem:[%s1646_s27 + $0x18] sm:$0xff]  ;;  %v234_v10 = vld [vmem:[%s1646_s27 + $0x20] sm:$0xff]  ;;  %v235_v12 = vld [vmem:[%s1646_s27 + $0x28] sm:$0xff] }
  0x13   : > { %1529 = vmatmul.mubr.msk.f32.vlgmr.msra.gmra.mxu1 %vm302_vm0, %v263_v5  ;;  %1483 = vmatprep.mubr.msk.f32.mxu0 %vm302_vm0, %v232_v6  ;;  %v265_v9 = vld [vmem:[%s1646_s27 + $0x118] sm:$0xff]  ;;  %v266_v11 = vld [vmem:[%s1646_s27 + $0x120] sm:$0xff]  ;;  %v267_v13 = vld [vmem:[%s1646_s27 + $0x128] sm:$0xff] }
  0x14   : > { %1531 = vmatprep.mubr.msk.f32.mxu1 %vm302_vm0, %v264_v7  ;;  %v236_v14 = vld [vmem:[%s1646_s27 + $0x30] sm:$0xff]  ;;  %v237_v16 = vld [vmem:[%s1646_s27 + $0x38] sm:$0xff]  ;;  %v238_v18 = vld [vmem:[%s1646_s27 + $0x40] sm:$0xff] }
  0x15   : > { %v268_v15 = vld [vmem:[%s1646_s27 + $0x130] sm:$0xff]  ;;  %v269_v17 = vld [vmem:[%s1646_s27 + $0x138] sm:$0xff]  ;;  %v270_v19 = vld [vmem:[%s1646_s27 + $0x140] sm:$0xff] }
  0x16   : > { %1484 = vmatmul.mubr.msk.f32.gmra.mxu0 %vm302_vm0, %v233_v8  ;;  %v239_v20 = vld [vmem:[%s1646_s27 + $0x48] sm:$0xff]  ;;  %v240_v22 = vld [vmem:[%s1646_s27 + $0x50] sm:$0xff]  ;;  %v241_v24 = vld [vmem:[%s1646_s27 + $0x58] sm:$0xff] }
  0x17   : > { %1532 = vmatmul.mubr.msk.f32.gmra.mxu1 %vm302_vm0, %v265_v9  ;;  %1486 = vmatprep.mubr.msk.f32.mxu0 %vm302_vm0, %v234_v10  ;;  %v271_v21 = vld [vmem:[%s1646_s27 + $0x148] sm:$0xff]  ;;  %v272_v23 = vld [vmem:[%s1646_s27 + $0x150] sm:$0xff]  ;;  %v273_v25 = vld [vmem:[%s1646_s27 + $0x158] sm:$0xff] }
  0x18   : > { %1534 = vmatprep.mubr.msk.f32.mxu1 %vm302_vm0, %v266_v11  ;;  %v242_v26 = vld [vmem:[%s1646_s27 + $0x60] sm:$0xff]  ;;  %v243_v28 = vld [vmem:[%s1646_s27 + $0x68] sm:$0xff]  ;;  %v244_v30 = vld [vmem:[%s1646_s27 + $0x70] sm:$0xff] }
  0x19   : > { %v274_v27 = vld [vmem:[%s1646_s27 + $0x160] sm:$0xff]  ;;  %v275_v29 = vld [vmem:[%s1646_s27 + $0x168] sm:$0xff]  ;;  %v276_v31 = vld [vmem:[%s1646_s27 + $0x170] sm:$0xff] }
  0x1a   : > { %1487 = vmatmul.mubr.msk.f32.gmra.mxu0 %vm302_vm0, %v235_v12  ;;  %v245_v32 = vld [vmem:[%s1646_s27 + $0x78] sm:$0xff]  ;;  %v246_v34 = vld [vmem:[%s1646_s27 + $0x80] sm:$0xff]  ;;  %v247_v36 = vld [vmem:[%s1646_s27 + $0x88] sm:$0xff] }
  0x1b   : > { %1535 = vmatmul.mubr.msk.f32.gmra.mxu1 %vm302_vm0, %v267_v13  ;;  %1489 = vmatprep.mubr.msk.f32.mxu0 %vm302_vm0, %v236_v14  ;;  %v277_v33 = vld [vmem:[%s1646_s27 + $0x178] sm:$0xff]  ;;  %v278_v35 = vld [vmem:[%s1646_s27 + $0x180] sm:$0xff]  ;;  %v279_v37 = vld [vmem:[%s1646_s27 + $0x188] sm:$0xff] }
  0x1c   : > { %1537 = vmatprep.mubr.msk.f32.mxu1 %vm302_vm0, %v268_v15  ;;  %v248_v38 = vld [vmem:[%s1646_s27 + $0x90] sm:$0xff]  ;;  %v249_v40 = vld [vmem:[%s1646_s27 + $0x98] sm:$0xff]  ;;  %v250_v42 = vld [vmem:[%s1646_s27 + $0xa0] sm:$0xff] }
  0x1d   : > { %v280_v39 = vld [vmem:[%s1646_s27 + $0x190] sm:$0xff]  ;;  %v281_v41 = vld [vmem:[%s1646_s27 + $0x198] sm:$0xff]  ;;  %v282_v43 = vld [vmem:[%s1646_s27 + $0x1a0] sm:$0xff] }
  0x1e   : > { %1490 = vmatmul.mubr.msk.f32.gmra.mxu0 %vm302_vm0, %v237_v16  ;;  %v251_v44 = vld [vmem:[%s1646_s27 + $0xa8] sm:$0xff]  ;;  %v252_v46 = vld [vmem:[%s1646_s27 + $0xb0] sm:$0xff]  ;;  %v253_v48 = vld [vmem:[%s1646_s27 + $0xb8] sm:$0xff] }
  0x1f   : > { %1538 = vmatmul.mubr.msk.f32.gmra.mxu1 %vm302_vm0, %v269_v17  ;;  %1492 = vmatprep.mubr.msk.f32.mxu0 %vm302_vm0, %v238_v18  ;;  %v283_v45 = vld [vmem:[%s1646_s27 + $0x1a8] sm:$0xff]  ;;  %v284_v47 = vld [vmem:[%s1646_s27 + $0x1b0] sm:$0xff]  ;;  %v285_v49 = vld [vmem:[%s1646_s27 + $0x1b8] sm:$0xff] }
  0x20   : > { %1540 = vmatprep.mubr.msk.f32.mxu1 %vm302_vm0, %v270_v19  ;;  %v254_v50 = vld [vmem:[%s1646_s27 + $0xc0] sm:$0xff]  ;;  %v255_v52 = vld [vmem:[%s1646_s27 + $0xc8] sm:$0xff]  ;;  %v256_v54 = vld [vmem:[%s1646_s27 + $0xd0] sm:$0xff] }
  0x21   : > { %v286_v51 = vld [vmem:[%s1646_s27 + $0x1c0] sm:$0xff]  ;;  %v287_v53 = vld [vmem:[%s1646_s27 + $0x1c8] sm:$0xff]  ;;  %v288_v55 = vld [vmem:[%s1646_s27 + $0x1d0] sm:$0xff] }
  0x22   : > { %1493 = vmatmul.mubr.msk.f32.gmra.mxu0 %vm302_vm0, %v239_v20  ;;  %v257_v56 = vld [vmem:[%s1646_s27 + $0xd8] sm:$0xff]  ;;  %v258_v58 = vld [vmem:[%s1646_s27 + $0xe0] sm:$0xff]  ;;  %v259_v60 = vld [vmem:[%s1646_s27 + $0xe8] sm:$0xff] }
  0x23   : > { %1541 = vmatmul.mubr.msk.f32.gmra.mxu1 %vm302_vm0, %v271_v21  ;;  %1495 = vmatprep.mubr.msk.f32.mxu0 %vm302_vm0, %v240_v22  ;;  %v289_v57 = vld [vmem:[%s1646_s27 + $0x1d8] sm:$0xff]  ;;  %v290_v59 = vld [vmem:[%s1646_s27 + $0x1e0] sm:$0xff]  ;;  %v291_v61 = vld [vmem:[%s1646_s27 + $0x1e8] sm:$0xff] }
  0x24   : > { %1543 = vmatprep.mubr.msk.f32.mxu1 %vm302_vm0, %v272_v23  ;;  %v260_v62 = vld [vmem:[%s1646_s27 + $0xf0] sm:$0xff]  ;;  %v261_v0 = vld [vmem:[%s1646_s27 + $0xf8] sm:$0xff]  ;;  %v1779_v2 = vld [vmem:[%s2231_s2] ss:$0 sm:$0xff] }
  0x25   : > { %v292_v63 = vld [vmem:[%s1646_s27 + $0x1f0] sm:$0xff]  ;;  %v293_v1 = vld [vmem:[%s1646_s27 + $0x1f8] sm:$0xff]  ;;  %v1787_v12 = vld [vmem:[%s2232_s3] ss:$0 sm:$0xff] }
  0x26   : > { %1496 = vmatmul.mubr.msk.f32.gmra.mxu0 %vm302_vm0, %v241_v24 }
  0x27   : > { %1544 = vmatmul.mubr.msk.f32.gmra.mxu1 %vm302_vm0, %v273_v25  ;;  %1498 = vmatprep.mubr.msk.f32.mxu0 %vm302_vm0, %v242_v26 }
  0x28   : > { %1546 = vmatprep.mubr.msk.f32.mxu1 %vm302_vm0, %v274_v27 }
  0x2a   : > { %1499 = vmatmul.mubr.msk.f32.gmra.mxu0 %vm302_vm0, %v243_v28 }
  0x2b   : > { %1547 = vmatmul.mubr.msk.f32.gmra.mxu1 %vm302_vm0, %v275_v29  ;;  %1501 = vmatprep.mubr.msk.f32.mxu0 %vm302_vm0, %v244_v30 }
  0x2c   : > { %1549 = vmatprep.mubr.msk.f32.mxu1 %vm302_vm0, %v276_v31 }
  0x2e   : > { %1502 = vmatmul.mubr.msk.f32.gmra.mxu0 %vm302_vm0, %v245_v32 }
  0x2f   : > { %1550 = vmatmul.mubr.msk.f32.gmra.mxu1 %vm302_vm0, %v277_v33  ;;  %1504 = vmatprep.mubr.msk.f32.mxu0 %vm302_vm0, %v246_v34 }
  0x30   : > { %1552 = vmatprep.mubr.msk.f32.mxu1 %vm302_vm0, %v278_v35 }
  0x32   : > { %1505 = vmatmul.mubr.msk.f32.gmra.mxu0 %vm302_vm0, %v247_v36 }
  0x33   : > { %1553 = vmatmul.mubr.msk.f32.gmra.mxu1 %vm302_vm0, %v279_v37  ;;  %1507 = vmatprep.mubr.msk.f32.mxu0 %vm302_vm0, %v248_v38 }
  0x34   : > { %1555 = vmatprep.mubr.msk.f32.mxu1 %vm302_vm0, %v280_v39 }
  0x36   : > { %1508 = vmatmul.mubr.msk.f32.gmra.mxu0 %vm302_vm0, %v249_v40 }
  0x37   : > { %1556 = vmatmul.mubr.msk.f32.gmra.mxu1 %vm302_vm0, %v281_v41  ;;  %1510 = vmatprep.mubr.msk.f32.mxu0 %vm302_vm0, %v250_v42 }
  0x38   : > { %1558 = vmatprep.mubr.msk.f32.mxu1 %vm302_vm0, %v282_v43 }
  0x3a   : > { %1511 = vmatmul.mubr.msk.f32.gmra.mxu0 %vm302_vm0, %v251_v44 }
  0x3b   : > { %1559 = vmatmul.mubr.msk.f32.gmra.mxu1 %vm302_vm0, %v283_v45  ;;  %1513 = vmatprep.mubr.msk.f32.mxu0 %vm302_vm0, %v252_v46 }
  0x3c   : > { %1561 = vmatprep.mubr.msk.f32.mxu1 %vm302_vm0, %v284_v47 }
  0x3e   : > { %1514 = vmatmul.mubr.msk.f32.gmra.mxu0 %vm302_vm0, %v253_v48 }
  0x3f   : > { %1562 = vmatmul.mubr.msk.f32.gmra.mxu1 %vm302_vm0, %v285_v49  ;;  %1516 = vmatprep.mubr.msk.f32.mxu0 %vm302_vm0, %v254_v50 }
  0x40   : > { %1564 = vmatprep.mubr.msk.f32.mxu1 %vm302_vm0, %v286_v51 }
  0x42   : > { %1517 = vmatmul.mubr.msk.f32.gmra.mxu0 %vm302_vm0, %v255_v52 }
  0x43   : > { %1565 = vmatmul.mubr.msk.f32.gmra.mxu1 %vm302_vm0, %v287_v53  ;;  %1519 = vmatprep.mubr.msk.f32.mxu0 %vm302_vm0, %v256_v54 }
  0x44   : > { %1567 = vmatprep.mubr.msk.f32.mxu1 %vm302_vm0, %v288_v55 }
  0x46   : > { %1520 = vmatmul.mubr.msk.f32.gmra.mxu0 %vm302_vm0, %v257_v56 }
  0x47   : > { %1568 = vmatmul.mubr.msk.f32.gmra.mxu1 %vm302_vm0, %v289_v57  ;;  %1522 = vmatprep.mubr.msk.f32.mxu0 %vm302_vm0, %v258_v58 }
  0x48   : > { %1570 = vmatprep.mubr.msk.f32.mxu1 %vm302_vm0, %v290_v59 }
  0x4a   : > { %1523 = vmatmul.mubr.msk.f32.gmra.mxu0 %vm302_vm0, %v259_v60 }
  0x4b   : > { %1571 = vmatmul.mubr.msk.f32.gmra.mxu1 %vm302_vm0, %v291_v61  ;;  %1525 = vmatprep.mubr.msk.f32.mxu0 %vm302_vm0, %v260_v62 }
  0x4c   : > { %1573 = vmatprep.mubr.msk.f32.mxu1 %vm302_vm0, %v292_v63 }
  0x4e   : > { %1526 = vmatmul.mubr.msk.f32.gmra.mxu0 %vm302_vm0, %v261_v0 }
  0x4f   : > { %1574 = vmatmul.mubr.msk.f32.gmra.mxu1 %vm302_vm0, %v293_v1 }
  0xd2   : > { %v1482_v3 = vpop.f32.mrf.mxu0 }
  0xd3   : > { %v1530_v4 = vpop.f32.mrf.mxu1  ;;  %v567_v5 = vadd.f32 %v1482_v3, %v1779_v2 }
  0xd4   : > { %v727_v6 = vadd.f32 %v1530_v4, %v1779_v2  ;;  %v561_v7 = vpop.f32.mrf.mxu0 }
  0xd5   : > { %v721_v8 = vpop.f32.mrf.mxu1  ;;  %v881_v9 = vmax.f32 %v567_v5, 0.0  ;;  %v562_v11 = vadd.f32 %v1779_v2, %v561_v7 }
  0xd6   : > { %v913_v10 = vmax.f32 %v727_v6, 0.0  ;;  %v1485_v13 = vpop.f32.mrf.mxu0  ;;  %v722_v18 = vadd.f32 %v1779_v2, %v721_v8 }
  0xd7   : > { %v1533_v14 = vpop.f32.mrf.mxu1  ;;  %v577_v15 = vadd.f32 %v1485_v13, %v1779_v2  ;;  %v880_v17 = vmax.f32 %v562_v11, 0.0  ;;  %v952_v21 = vmul.f32 %v1787_v12, %v881_v9 }
  0xd8   : > { %v737_v16 = vadd.f32 %v1533_v14, %v1779_v2  ;;  %v571_v19 = vpop.f32.mrf.mxu0  ;;  %v984_v20 = vmul.f32 %v1787_v12, %v913_v10  ;;  %v912_v28 = vmax.f32 %v722_v18, 0.0 }
  0xd9   : > { %v731_v22 = vpop.f32.mrf.mxu1  ;;  %v883_v23 = vmax.f32 %v577_v15, 0.0  ;;  %1017 = vadd.xlane.f32.xlu0 %v952_v21  ;;  %v572_v29 = vadd.f32 %v1779_v2, %v571_v19  ;;  %v951_v31 = vmul.f32 %v1787_v12, %v880_v17 }
  0xda   : > { %v915_v24 = vmax.f32 %v737_v16, 0.0  ;;  %1081 = vadd.xlane.f32.xlu1 %v984_v20  ;;  %v1488_v25 = vpop.f32.mrf.mxu0  ;;  %v732_v30 = vadd.f32 %v1779_v2, %v731_v22  ;;  %v983_v41 = vmul.f32 %v1787_v12, %v912_v28 }
  0xdb   : > { %v1536_v26 = vpop.f32.mrf.mxu1  ;;  %v954_v27 = vmul.f32 %v1787_v12, %v883_v23  ;;  %v587_v37 = vadd.f32 %v1488_v25, %v1779_v2  ;;  %v882_v38 = vmax.f32 %v572_v29, 0.0 }
  0xdc   : > { %v581_v32 = vpop.f32.mrf.mxu0  ;;  %v986_v34 = vmul.f32 %v1787_v12, %v915_v24  ;;  %v914_v39 = vmax.f32 %v732_v30, 0.0  ;;  %v747_v47 = vadd.f32 %v1536_v26, %v1779_v2 }
  0xdd   : > { %v741_v33 = vpop.f32.mrf.mxu1  ;;  %1015 = vadd.xlane.f32.xlu0 %v951_v31  ;;  %v582_v40 = vadd.f32 %v1779_v2, %v581_v32  ;;  %v885_v46 = vmax.f32 %v587_v37, 0.0  ;;  %v953_v50 = vmul.f32 %v1787_v12, %v882_v38 }
  0xde   : > { %1021 = vadd.xlane.f32.xlu1 %v954_v27  ;;  %v1491_v35 = vpop.f32.mrf.mxu0  ;;  %v742_v49 = vadd.f32 %v1779_v2, %v741_v33  ;;  %v985_v51 = vmul.f32 %v1787_v12, %v914_v39  ;;  %v917_v56 = vmax.f32 %v747_v47, 0.0 }
  0xdf   : > { %v1539_v36 = vpop.f32.mrf.mxu1  ;;  %v884_v48 = vmax.f32 %v582_v40, 0.0  ;;  %v597_v57 = vadd.f32 %v1491_v35, %v1779_v2  ;;  %v956_v60 = vmul.f32 %v1787_v12, %v885_v46 }
  0xe0   : > { %v591_v42 = vpop.f32.mrf.mxu0  ;;  %v916_v58 = vmax.f32 %v742_v49, 0.0  ;;  %v757_v0 = vadd.f32 %v1539_v36, %v1779_v2  ;;  %v988_v6 = vmul.f32 %v1787_v12, %v917_v56 }
  0xe1   : > { %v751_v43 = vpop.f32.mrf.mxu1  ;;  %1079 = vadd.xlane.f32.xlu0 %v983_v41  ;;  %v592_v59 = vadd.f32 %v1779_v2, %v591_v42  ;;  %v955_v61 = vmul.f32 %v1787_v12, %v884_v48  ;;  %v887_v4 = vmax.f32 %v597_v57, 0.0 }
  0xe2   : > { %1085 = vadd.xlane.f32.xlu1 %v986_v34  ;;  %v1494_v44 = vpop.f32.mrf.mxu0  ;;  %v752_v5 = vadd.f32 %v1779_v2, %v751_v43  ;;  %v987_v9 = vmul.f32 %v1787_v12, %v916_v58  ;;  %v919_v18 = vmax.f32 %v757_v0, 0.0 }
  0xe3   : > { %v1542_v45 = vpop.f32.mrf.mxu1  ;;  %v607_v7 = vadd.f32 %v1494_v44, %v1779_v2  ;;  %v886_v8 = vmax.f32 %v592_v59, 0.0  ;;  %v958_v21 = vmul.f32 %v1787_v12, %v887_v4 }
  0xe4   : > { %v601_v52 = vpop.f32.mrf.mxu0  ;;  %v767_v11 = vadd.f32 %v1542_v45, %v1779_v2  ;;  %v918_v19 = vmax.f32 %v752_v5, 0.0  ;;  %v990_v34 = vmul.f32 %v1787_v12, %v919_v18 }
  0xe5   : > { %v761_v53 = vpop.f32.mrf.mxu1  ;;  %1083 = vadd.xlane.f32.xlu0 %v985_v51  ;;  %v602_v10 = vadd.f32 %v1779_v2, %v601_v52  ;;  %v889_v20 = vmax.f32 %v607_v7, 0.0  ;;  %v957_v23 = vmul.f32 %v1787_v12, %v886_v8 }
  0xe6   : > { %1019 = vadd.xlane.f32.xlu1 %v953_v50  ;;  %v1497_v54 = vpop.f32.mrf.mxu0  ;;  %v762_v15 = vadd.f32 %v1779_v2, %v761_v53  ;;  %v921_v24 = vmax.f32 %v767_v11, 0.0  ;;  %v989_v35 = vmul.f32 %v1787_v12, %v918_v19 }
  0xe7   : > { %v1545_v55 = vpop.f32.mrf.mxu1  ;;  %v888_v22 = vmax.f32 %v602_v10, 0.0  ;;  %v617_v25 = vadd.f32 %v1497_v54, %v1779_v2  ;;  %v960_v36 = vmul.f32 %v1787_v12, %v889_v20 }
  0xe8   : > { %v611_v62 = vpop.f32.mrf.mxu0  ;;  %v777_v28 = vadd.f32 %v1545_v55, %v1779_v2  ;;  %v920_v29 = vmax.f32 %v762_v15, 0.0  ;;  %v992_v40 = vmul.f32 %v1787_v12, %v921_v24 }
  0xe9   : > { %v771_v63 = vpop.f32.mrf.mxu1  ;;  %1023 = vadd.xlane.f32.xlu0 %v955_v61  ;;  %v1837_v30 = vadd.f32 %v1779_v2, %v611_v62  ;;  %v891_v38 = vmax.f32 %v617_v25, 0.0  ;;  %v959_v39 = vmul.f32 %v1787_v12, %v888_v22 }
  0xea   : > { %1025 = vadd.xlane.f32.xlu1 %v956_v60  ;;  %v1500_v1 = vpop.f32.mrf.mxu0  ;;  %v1840_v31 = vadd.f32 %v1779_v2, %v771_v63  ;;  %v923_v44 = vmax.f32 %v777_v28, 0.0  ;;  %v991_v50 = vmul.f32 %v1787_v12, %v920_v29 }
  0xeb   : > { %v1811_v3 = vpop.f32.mrf.mxu1  ;;  %v890_v48 = vmax.f32 %v1837_v30, 0.0  ;;  %v1859_v58 = vadd.f32 %v1500_v1, %v1779_v2  ;;  %v962_v59 = vmul.f32 %v1787_v12, %v891_v38 }
  0xec   : > { %v1819_v13 = vpop.f32.mrf.mxu0  ;;  %v922_v49 = vmax.f32 %v1840_v31, 0.0  ;;  %v1873_v1 = vadd.f32 %v1811_v3, %v1779_v2  ;;  %v1876_v7 = vmul.f32 %v1787_v12, %v923_v44 }
  0xed   : > { %v1821_v14 = vpop.f32.mrf.mxu1  ;;  %1087 = vadd.xlane.f32.xlu0 %v987_v9  ;;  %v1888_v3 = vadd.f32 %v1779_v2, %v1819_v13  ;;  %v961_v13 = vmul.f32 %v1787_v12, %v890_v48 }
  0xee   : > { %1089 = vadd.xlane.f32.xlu1 %v988_v6  ;;  %v1824_v16 = vpop.f32.mrf.mxu0 }
  0xef   : > { %v1826_v17 = vpop.f32.mrf.mxu1 }
  0xf0   : > { %v1831_v26 = vpop.f32.mrf.mxu0 }
  0xf1   : > { %v1833_v27 = vpop.f32.mrf.mxu1  ;;  %1027 = vadd.xlane.f32.xlu0 %v957_v23 }
  0xf2   : > { %1029 = vadd.xlane.f32.xlu1 %v958_v21  ;;  %v1506_v32 = vpop.f32.mrf.mxu0  ;;  %v893_v21 = vmax.f32 %v1859_v58, 0.0 }
  0xf3   : > { %v1554_v33 = vpop.f32.mrf.mxu1  ;;  %v647_v37 = vadd.f32 %v1506_v32, %v1779_v2  ;;  %v1902_v32 = vadd.f32 %v1779_v2, %v1821_v14 }
  0xf4   : > { %v641_v41 = vpop.f32.mrf.mxu0  ;;  %v807_v42 = vadd.f32 %v1554_v33, %v1779_v2 }
  0xf5   : > { %v801_v43 = vpop.f32.mrf.mxu1  ;;  %v897_v45 = vmax.f32 %v647_v37, 0.0  ;;  %v642_v46 = vadd.f32 %v1779_v2, %v641_v41  ;;  %1091 = vadd.xlane.f32.xlu0 %v989_v35 }
  0xf6   : > { %v802_v47 = vadd.f32 %v1779_v2, %v801_v43  ;;  %1093 = vadd.xlane.f32.xlu1 %v990_v34  ;;  %v929_v51 = vmax.f32 %v807_v42, 0.0  ;;  %v1509_v52 = vpop.f32.mrf.mxu0  ;;  %v993_v42 = vmul.f32 %v1787_v12, %v922_v49  ;;  %v924_v49 = vmax.f32 %v1902_v32, 0.0 }
  0xf7   : > { %v1557_v53 = vpop.f32.mrf.mxu1  ;;  %v896_v54 = vmax.f32 %v642_v46, 0.0  ;;  %v657_v56 = vadd.f32 %v1509_v52, %v1779_v2  ;;  %v1856_v57 = vmul.f32 %v1787_v12, %v897_v45 }
  0xf8   : > { %v928_v55 = vmax.f32 %v802_v47, 0.0  ;;  %v651_v60 = vpop.f32.mrf.mxu0  ;;  %v817_v61 = vadd.f32 %v1557_v53, %v1779_v2  ;;  %v1864_v63 = vmul.f32 %v1787_v12, %v929_v51  ;;  %v892_v51 = vmax.f32 %v1888_v3, 0.0 }
  0xf9   : > { %v811_v62 = vpop.f32.mrf.mxu1  ;;  %v899_v0 = vmax.f32 %v657_v56, 0.0  ;;  %v652_v4 = vadd.f32 %v1779_v2, %v651_v60  ;;  %v1868_v5 = vmul.f32 %v1787_v12, %v896_v54  ;;  %1031 = vadd.xlane.f32.xlu0 %v959_v39 }
  0xfa   : > { %v812_v6 = vadd.f32 %v1779_v2, %v811_v62  ;;  %1033 = vadd.xlane.f32.xlu1 %v960_v36  ;;  %v931_v8 = vmax.f32 %v817_v61, 0.0  ;;  %v1879_v9 = vmul.f32 %v1787_v12, %v928_v55  ;;  %v1512_v10 = vpop.f32.mrf.mxu0  ;;  %v1933_v62 = vadd.f32 %v1824_v16, %v1779_v2 }
  0xfb   : > { %v1560_v11 = vpop.f32.mrf.mxu1  ;;  %v898_v15 = vmax.f32 %v652_v4, 0.0  ;;  %v667_v19 = vadd.f32 %v1512_v10, %v1779_v2  ;;  %v1883_v20 = vmul.f32 %v1787_v12, %v899_v0  ;;  %v1948_v16 = vadd.f32 %v1826_v17, %v1779_v2 }
  0xfc   : > { %v930_v18 = vmax.f32 %v812_v6, 0.0  ;;  %v661_v22 = vpop.f32.mrf.mxu0  ;;  %v827_v23 = vadd.f32 %v1560_v11, %v1779_v2  ;;  %v1892_v25 = vmul.f32 %v1787_v12, %v931_v8  ;;  %v963_v17 = vmul.f32 %v1787_v12, %v892_v51 }
  0xfd   : > { %v821_v24 = vpop.f32.mrf.mxu1  ;;  %v901_v28 = vmax.f32 %v667_v19, 0.0  ;;  %v662_v29 = vadd.f32 %v1779_v2, %v661_v22  ;;  %v1896_v30 = vmul.f32 %v1787_v12, %v898_v15  ;;  %1095 = vadd.xlane.f32.xlu0 %v991_v50 }
  0xfe   : > { %v822_v31 = vadd.f32 %v1779_v2, %v821_v24  ;;  %1097 = vadd.xlane.f32.xlu1 %v992_v40  ;;  %v933_v33 = vmax.f32 %v827_v23, 0.0  ;;  %v1905_v34 = vmul.f32 %v1787_v12, %v930_v18  ;;  %v1515_v35 = vpop.f32.mrf.mxu0  ;;  %v925_v40 = vmax.f32 %v1873_v1, 0.0 }
  0xff   : > { %v1563_v36 = vpop.f32.mrf.mxu1  ;;  %v900_v37 = vmax.f32 %v662_v29, 0.0  ;;  %v677_v39 = vadd.f32 %v1515_v35, %v1779_v2  ;;  %v1909_v41 = vmul.f32 %v1787_v12, %v901_v28 }
 0x100   : > { %v932_v38 = vmax.f32 %v822_v31, 0.0  ;;  %v671_v43 = vpop.f32.mrf.mxu0  ;;  %v837_v14 = vadd.f32 %v1563_v36, %v1779_v2  ;;  %v1915_v45 = vmul.f32 %v1787_v12, %v933_v33  ;;  %v996_v18 = vmul.f32 %v1787_v12, %v925_v40 }
 0x101   : > { %v831_v44 = vpop.f32.mrf.mxu1  ;;  %v903_v46 = vmax.f32 %v677_v39, 0.0  ;;  %v672_v47 = vadd.f32 %v1779_v2, %v671_v43  ;;  %v1919_v48 = vmul.f32 %v1787_v12, %v900_v37  ;;  %1035 = vadd.xlane.f32.xlu0 %v961_v13  ;;  %v895_v39 = vmax.f32 %v1933_v62, 0.0 }
 0x102   : > { %v832_v50 = vadd.f32 %v1779_v2, %v831_v44  ;;  %1037 = vadd.xlane.f32.xlu1 %v962_v59  ;;  %v935_v52 = vmax.f32 %v837_v14, 0.0  ;;  %v1925_v53 = vmul.f32 %v1787_v12, %v932_v38  ;;  %v1518_v54 = vpop.f32.mrf.mxu0  ;;  %v964_v59 = vmul.f32 %v1787_v12, %v893_v21 }
 0x103   : > { %v1566_v55 = vpop.f32.mrf.mxu1  ;;  %v902_v56 = vmax.f32 %v672_v47, 0.0  ;;  %v687_v60 = vadd.f32 %v1518_v54, %v1779_v2  ;;  %v1929_v61 = vmul.f32 %v1787_v12, %v903_v46 }
 0x104   : > { %v934_v58 = vmax.f32 %v832_v50, 0.0  ;;  %v681_v0 = vpop.f32.mrf.mxu0  ;;  %v847_v4 = vadd.f32 %v1566_v55, %v1779_v2  ;;  %v1938_v1 = vmul.f32 %v1787_v12, %v935_v52  ;;  %v995_v52 = vmul.f32 %v1787_v12, %v924_v49 }
 0x105   : > { %v841_v6 = vpop.f32.mrf.mxu1  ;;  %v905_v8 = vmax.f32 %v687_v60, 0.0  ;;  %v682_v10 = vadd.f32 %v1779_v2, %v681_v0  ;;  %v1942_v11 = vmul.f32 %v1787_v12, %v902_v56  ;;  %1099 = vadd.xlane.f32.xlu0 %v993_v42  ;;  %v927_v0 = vmax.f32 %v1948_v16, 0.0 }
 0x106   : > { %v842_v15 = vadd.f32 %v1779_v2, %v841_v6  ;;  %1101 = vadd.xlane.f32.xlu1 %v1876_v7  ;;  %v937_v19 = vmax.f32 %v847_v4, 0.0  ;;  %v1952_v21 = vmul.f32 %v1787_v12, %v934_v58  ;;  %v1521_v3 = vpop.f32.mrf.mxu0  ;;  %v632_v7 = vadd.f32 %v1779_v2, %v1831_v26 }
 0x107   : > { %v1569_v22 = vpop.f32.mrf.mxu1  ;;  %v904_v23 = vmax.f32 %v682_v10, 0.0  ;;  %v697_v28 = vadd.f32 %v1521_v3, %v1779_v2  ;;  %v1956_v29 = vmul.f32 %v1787_v12, %v905_v8  ;;  %v792_v26 = vadd.f32 %v1779_v2, %v1833_v27 }
 0x108   : > { %v936_v24 = vmax.f32 %v842_v15, 0.0  ;;  %v691_v31 = vpop.f32.mrf.mxu0  ;;  %v857_v13 = vadd.f32 %v1569_v22, %v1779_v2  ;;  %v1963_v33 = vmul.f32 %v1787_v12, %v937_v19  ;;  %v894_v51 = vmax.f32 %v632_v7, 0.0 }
 0x109   : > { %v851_v32 = vpop.f32.mrf.mxu1  ;;  %v907_v35 = vmax.f32 %v697_v28, 0.0  ;;  %v692_v36 = vadd.f32 %v1779_v2, %v691_v31  ;;  %v1967_v37 = vmul.f32 %v1787_v12, %v904_v23  ;;  %1039 = vadd.xlane.f32.xlu0 %v963_v17  ;;  %v926_v4 = vmax.f32 %v792_v26, 0.0 }
 0x10a   : > { %v852_v38 = vadd.f32 %v1779_v2, %v851_v32  ;;  %1041 = vadd.xlane.f32.xlu1 %v964_v59  ;;  %v939_v40 = vmax.f32 %v857_v13, 0.0  ;;  %v1974_v42 = vmul.f32 %v1787_v12, %v936_v24  ;;  %v1524_v43 = vpop.f32.mrf.mxu0  ;;  %v966_v23 = vmul.f32 %v1787_v12, %v895_v39 }
 0x10b   : > { %v1572_v14 = vpop.f32.mrf.mxu1  ;;  %v906_v44 = vmax.f32 %v692_v36, 0.0  ;;  %v707_v47 = vadd.f32 %v1524_v43, %v1779_v2  ;;  %v1978_v50 = vmul.f32 %v1787_v12, %v907_v35  ;;  %v965_v24 = vmul.f32 %v1787_v12, %v894_v51 }
 0x10c   : > { %v938_v46 = vmax.f32 %v852_v38, 0.0  ;;  %v701_v54 = vpop.f32.mrf.mxu0  ;;  %v867_v55 = vadd.f32 %v1572_v14, %v1779_v2  ;;  %v1010_v56 = vmul.f32 %v1787_v12, %v939_v40  ;;  %v998_v40 = vmul.f32 %v1787_v12, %v927_v0 }
 0x10d   : > { %v861_v27 = vpop.f32.mrf.mxu1  ;;  %v909_v58 = vmax.f32 %v707_v47, 0.0  ;;  %v702_v60 = vadd.f32 %v1779_v2, %v701_v54  ;;  %v977_v62 = vmul.f32 %v1787_v12, %v906_v44  ;;  %1103 = vadd.xlane.f32.xlu0 %v995_v52  ;;  %v997_v43 = vmul.f32 %v1787_v12, %v926_v4 }
 0x10e   : > { %v862_v59 = vadd.f32 %v1779_v2, %v861_v27  ;;  %1105 = vadd.xlane.f32.xlu1 %v996_v18  ;;  %v941_v6 = vmax.f32 %v867_v55, 0.0  ;;  %v1009_v49 = vmul.f32 %v1787_v12, %v938_v46  ;;  %v1527_v8 = vpop.f32.mrf.mxu0 }
 0x10f   : > { %v1575_v10 = vpop.f32.mrf.mxu1  ;;  %v908_v15 = vmax.f32 %v702_v60, 0.0  ;;  %v717_v3 = vadd.f32 %v1527_v8, %v1779_v2  ;;  %v980_v22 = vmul.f32 %v1787_v12, %v909_v58 }
 0x110   : > { %v940_v19 = vmax.f32 %v862_v59, 0.0  ;;  %v711_v28 = vpop.f32.mrf.mxu0  ;;  %v877_v16 = vadd.f32 %v1575_v10, %v1779_v2  ;;  %v1012_v7 = vmul.f32 %v1787_v12, %v941_v6 }
 0x111   : > { %v871_v18 = vpop.f32.mrf.mxu1  ;;  %v911_v17 = vmax.f32 %v717_v3, 0.0  ;;  %v712_v31 = vadd.f32 %v1779_v2, %v711_v28  ;;  %v979_v13 = vmul.f32 %v1787_v12, %v908_v15  ;;  %1043 = vadd.xlane.f32.xlu0 %v965_v24 }
 0x112   : > { %v872_v32 = vadd.f32 %v1779_v2, %v871_v18  ;;  %1045 = vadd.xlane.f32.xlu1 %v966_v23  ;;  %v943_v35 = vmax.f32 %v877_v16, 0.0  ;;  %v1011_v36 = vmul.f32 %v1787_v12, %v940_v19  ;;  %v2025_v2 = vld [vmem:[#allocation2] ss:$0 sm:$0xff] }
 0x113   : > { %v910_v38 = vmax.f32 %v712_v31, 0.0  ;;  %v982_v26 = vmul.f32 %v1787_v12, %v911_v17 }
 0x114   : > { %v942_v39 = vmax.f32 %v872_v32, 0.0  ;;  %v1014_v14 = vmul.f32 %v1787_v12, %v943_v35 }
 0x115   : > { %v981_v44 = vmul.f32 %v1787_v12, %v910_v38  ;;  %1107 = vadd.xlane.f32.xlu0 %v997_v43 }
 0x116   : > { %v1013_v46 = vmul.f32 %v1787_v12, %v942_v39  ;;  %1109 = vadd.xlane.f32.xlu1 %v998_v40 }
 0x119   : > { %1047 = vadd.xlane.f32.xlu0 %v1868_v5 }
 0x11a   : > { %1049 = vadd.xlane.f32.xlu1 %v1856_v57 }
 0x11d   : > { %1111 = vadd.xlane.f32.xlu0 %v1879_v9 }
 0x11e   : > { %1113 = vadd.xlane.f32.xlu1 %v1864_v63 }
 0x121   : > { %1051 = vadd.xlane.f32.xlu0 %v1896_v30 }
 0x122   : > { %1053 = vadd.xlane.f32.xlu1 %v1883_v20 }
 0x125   : > { %1115 = vadd.xlane.f32.xlu0 %v1905_v34 }
 0x126   : > { %1117 = vadd.xlane.f32.xlu1 %v1892_v25 }
 0x129   : > { %1055 = vadd.xlane.f32.xlu0 %v1919_v48 }
 0x12a   : > { %1057 = vadd.xlane.f32.xlu1 %v1909_v41 }
 0x12d   : > { %1119 = vadd.xlane.f32.xlu0 %v1925_v53 }
 0x12e   : > { %1121 = vadd.xlane.f32.xlu1 %v1915_v45 }
 0x131   : > { %1059 = vadd.xlane.f32.xlu0 %v1942_v11 }
 0x132   : > { %1061 = vadd.xlane.f32.xlu1 %v1929_v61 }
 0x135   : > { %1123 = vadd.xlane.f32.xlu0 %v1952_v21 }
 0x136   : > { %1125 = vadd.xlane.f32.xlu1 %v1938_v1 }
 0x139   : > { %1063 = vadd.xlane.f32.xlu0 %v1967_v37 }
 0x13a   : > { %1065 = vadd.xlane.f32.xlu1 %v1956_v29 }
 0x13d   : > { %1127 = vadd.xlane.f32.xlu0 %v1974_v42 }
 0x13e   : > { %1129 = vadd.xlane.f32.xlu1 %v1963_v33 }
 0x141   : > { %1067 = vadd.xlane.f32.xlu0 %v977_v62 }
 0x142   : > { %1069 = vadd.xlane.f32.xlu1 %v1978_v50 }
 0x145   : > { %1131 = vadd.xlane.f32.xlu0 %v1009_v49 }
 0x146   : > { %1133 = vadd.xlane.f32.xlu1 %v1010_v56 }
 0x149   : > { %1071 = vadd.xlane.f32.xlu0 %v979_v13 }
 0x14a   : > { %1073 = vadd.xlane.f32.xlu1 %v980_v22 }
 0x14d   : > { %1135 = vadd.xlane.f32.xlu0 %v1011_v36 }
 0x14e   : > { %1137 = vadd.xlane.f32.xlu1 %v1012_v7 }
 0x151   : > { %1075 = vadd.xlane.f32.xlu0 %v981_v44 }
 0x152   : > { %1077 = vadd.xlane.f32.xlu1 %v982_v26 }
 0x155   : > { %1139 = vadd.xlane.f32.xlu0 %v1013_v46 }
 0x156   : > { %1141 = vadd.xlane.f32.xlu1 %v1014_v14 }
 0x162   : > { %v1018_v57 = vpop.xlane.xlu0 %1017 }
 0x163   : > { %v1082_v12 = vpop.xlane.xlu1 %1081  ;;  %v1151_v5 = vadd.f32 %v2025_v2, %v1018_v57 }
 0x164   : > { %v1183_v63 = vadd.f32 %v2025_v2, %v1082_v12 }
 0x165   : > { %1216 = vst.msk [vmem:[%s2032_s9 + $0x8] sm:$0xff] %vm1214_vm1, %v1151_v5 }
 0x166   : > { %1248 = vst.msk [vmem:[%s2032_s9 + $0x108] sm:$0xff] %vm1214_vm1, %v1183_v63  ;;  %v1016_v20 = vpop.xlane.xlu0 %1015 }
 0x167   : > { %v1022_v9 = vpop.xlane.xlu1 %1021  ;;  %v1150_v30 = vadd.f32 %v2025_v2, %v1016_v20 }
 0x168   : > { %v1153_v25 = vadd.f32 %v2025_v2, %v1022_v9 }
 0x169   : > { %1215 = vst.msk [vmem:[%s2032_s9] sm:$0xff] %vm1214_vm1, %v1150_v30 }
 0x16a   : > { %1218 = vst.msk [vmem:[%s2032_s9 + $0x18] sm:$0xff] %vm1214_vm1, %v1153_v25  ;;  %v1080_v41 = vpop.xlane.xlu0 %1079 }
 0x16b   : > { %v1086_v34 = vpop.xlane.xlu1 %1085  ;;  %v1182_v48 = vadd.f32 %v2025_v2, %v1080_v41 }
 0x16c   : > { %v1185_v45 = vadd.f32 %v2025_v2, %v1086_v34 }
 0x16d   : > { %1247 = vst.msk [vmem:[%s2032_s9 + $0x100] sm:$0xff] %vm1214_vm1, %v1182_v48 }
 0x16e   : > { %1250 = vst.msk [vmem:[%s2032_s9 + $0x118] sm:$0xff] %vm1214_vm1, %v1185_v45  ;;  %v1084_v61 = vpop.xlane.xlu0 %1083 }
 0x16f   : > { %v1020_v53 = vpop.xlane.xlu1 %1019  ;;  %v1184_v11 = vadd.f32 %v2025_v2, %v1084_v61 }
 0x170   : > { %v1152_v1 = vadd.f32 %v2025_v2, %v1020_v53 }
 0x171   : > { %1249 = vst.msk [vmem:[%s2032_s9 + $0x110] sm:$0xff] %vm1214_vm1, %v1184_v11 }
 0x172   : > { %1217 = vst.msk [vmem:[%s2032_s9 + $0x10] sm:$0xff] %vm1214_vm1, %v1152_v1  ;;  %v1024_v29 = vpop.xlane.xlu0 %1023 }
 0x173   : > { %v1026_v21 = vpop.xlane.xlu1 %1025  ;;  %v1154_v37 = vadd.f32 %v2025_v2, %v1024_v29 }
 0x174   : > { %v1155_v33 = vadd.f32 %v2025_v2, %v1026_v21 }
 0x175   : > { %1219 = vst.msk [vmem:[%s2032_s9 + $0x20] sm:$0xff] %vm1214_vm1, %v1154_v37 }
 0x176   : > { %1220 = vst.msk [vmem:[%s2032_s9 + $0x28] sm:$0xff] %vm1214_vm1, %v1155_v33  ;;  %v1088_v47 = vpop.xlane.xlu0 %1087 }
 0x177   : > { %v1090_v42 = vpop.xlane.xlu1 %1089  ;;  %v1186_v51 = vadd.f32 %v2025_v2, %v1088_v47 }
 0x178   : > { %v1187_v50 = vadd.f32 %v2025_v2, %v1090_v42 }
 0x179   : > { %1251 = vst.msk [vmem:[%s2032_s9 + $0x120] sm:$0xff] %vm1214_vm1, %v1186_v51 }
 0x17a   : > { %1252 = vst.msk [vmem:[%s2032_s9 + $0x128] sm:$0xff] %vm1214_vm1, %v1187_v50  ;;  %v1028_v54 = vpop.xlane.xlu0 %1027 }
 0x17b   : > { %v1030_v52 = vpop.xlane.xlu1 %1029  ;;  %v1156_v27 = vadd.f32 %v2025_v2, %v1028_v54 }
 0x17c   : > { %v1157_v55 = vadd.f32 %v2025_v2, %v1030_v52 }
 0x17d   : > { %1221 = vst.msk [vmem:[%s2032_s9 + $0x30] sm:$0xff] %vm1214_vm1, %v1156_v27 }
 0x17e   : > { %1222 = vst.msk [vmem:[%s2032_s9 + $0x38] sm:$0xff] %vm1214_vm1, %v1157_v55  ;;  %v1092_v58 = vpop.xlane.xlu0 %1091 }
 0x17f   : > { %v1094_v56 = vpop.xlane.xlu1 %1093  ;;  %v1188_v62 = vadd.f32 %v2025_v2, %v1092_v58 }
 0x180   : > { %v1189_v60 = vadd.f32 %v2025_v2, %v1094_v56 }
 0x181   : > { %1253 = vst.msk [vmem:[%s2032_s9 + $0x130] sm:$0xff] %vm1214_vm1, %v1188_v62 }
 0x182   : > { %1254 = vst.msk [vmem:[%s2032_s9 + $0x138] sm:$0xff] %vm1214_vm1, %v1189_v60  ;;  %v1032_v0 = vpop.xlane.xlu0 %1031 }
 0x183   : > { %v1034_v59 = vpop.xlane.xlu1 %1033  ;;  %v1158_v6 = vadd.f32 %v2025_v2, %v1032_v0 }
 0x184   : > { %v1159_v4 = vadd.f32 %v2025_v2, %v1034_v59 }
 0x185   : > { %1223 = vst.msk [vmem:[%s2032_s9 + $0x40] sm:$0xff] %vm1214_vm1, %v1158_v6 }
 0x186   : > { %1224 = vst.msk [vmem:[%s2032_s9 + $0x48] sm:$0xff] %vm1214_vm1, %v1159_v4  ;;  %v1096_v8 = vpop.xlane.xlu0 %1095 }
 0x187   : > { %v1098_v49 = vpop.xlane.xlu1 %1097  ;;  %v1190_v15 = vadd.f32 %v2025_v2, %v1096_v8 }
 0x188   : > { %v1191_v10 = vadd.f32 %v2025_v2, %v1098_v49 }
 0x189   : > { %1255 = vst.msk [vmem:[%s2032_s9 + $0x140] sm:$0xff] %vm1214_vm1, %v1190_v15 }
 0x18a   : > { %1256 = vst.msk [vmem:[%s2032_s9 + $0x148] sm:$0xff] %vm1214_vm1, %v1191_v10  ;;  %v1036_v3 = vpop.xlane.xlu0 %1035 }
 0x18b   : > { %v1038_v19 = vpop.xlane.xlu1 %1037  ;;  %v1160_v23 = vadd.f32 %v2025_v2, %v1036_v3 }
 0x18c   : > { %v1161_v22 = vadd.f32 %v2025_v2, %v1038_v19 }
 0x18d   : > { %1225 = vst.msk [vmem:[%s2032_s9 + $0x50] sm:$0xff] %vm1214_vm1, %v1160_v23 }
 0x18e   : > { %1226 = vst.msk [vmem:[%s2032_s9 + $0x58] sm:$0xff] %vm1214_vm1, %v1161_v22  ;;  %v1100_v28 = vpop.xlane.xlu0 %1099 }
 0x18f   : > { %v1102_v24 = vpop.xlane.xlu1 %1101  ;;  %v1192_v18 = vadd.f32 %v2025_v2, %v1100_v28 }
 0x190   : > { %v1193_v16 = vadd.f32 %v2025_v2, %v1102_v24 }
 0x191   : > { %1257 = vst.msk [vmem:[%s2032_s9 + $0x150] sm:$0xff] %vm1214_vm1, %v1192_v18 }
 0x192   : > { %1258 = vst.msk [vmem:[%s2032_s9 + $0x158] sm:$0xff] %vm1214_vm1, %v1193_v16  ;;  %v1040_v17 = vpop.xlane.xlu0 %1039 }
 0x193   : > { %v1042_v7 = vpop.xlane.xlu1 %1041  ;;  %v1162_v13 = vadd.f32 %v2025_v2, %v1040_v17 }
 0x194   : > { %v1163_v31 = vadd.f32 %v2025_v2, %v1042_v7 }
 0x195   : > { %1227 = vst.msk [vmem:[%s2032_s9 + $0x60] sm:$0xff] %vm1214_vm1, %v1162_v13 }
 0x196   : > { %1228 = vst.msk [vmem:[%s2032_s9 + $0x68] sm:$0xff] %vm1214_vm1, %v1163_v31  ;;  %v1104_v35 = vpop.xlane.xlu0 %1103 }
 0x197   : > { %v1106_v32 = vpop.xlane.xlu1 %1105  ;;  %v1194_v38 = vadd.f32 %v2025_v2, %v1104_v35 }
 0x198   : > { %v1195_v36 = vadd.f32 %v2025_v2, %v1106_v32 }
 0x199   : > { %1259 = vst.msk [vmem:[%s2032_s9 + $0x160] sm:$0xff] %vm1214_vm1, %v1194_v38 }
 0x19a   : > { %1260 = vst.msk [vmem:[%s2032_s9 + $0x168] sm:$0xff] %vm1214_vm1, %v1195_v36  ;;  %v1044_v26 = vpop.xlane.xlu0 %1043 }
 0x19b   : > { %v1046_v39 = vpop.xlane.xlu1 %1045  ;;  %v1164_v43 = vadd.f32 %v2025_v2, %v1044_v26 }
 0x19c   : > { %v1165_v40 = vadd.f32 %v2025_v2, %v1046_v39 }
 0x19d   : > { %1229 = vst.msk [vmem:[%s2032_s9 + $0x70] sm:$0xff] %vm1214_vm1, %v1164_v43 }
 0x19e   : > { %1230 = vst.msk [vmem:[%s2032_s9 + $0x78] sm:$0xff] %vm1214_vm1, %v1165_v40  ;;  %v1108_v44 = vpop.xlane.xlu0 %1107 }
 0x19f   : > { %v1110_v14 = vpop.xlane.xlu1 %1109  ;;  %v1196_v12 = vadd.f32 %v2025_v2, %v1108_v44 }
 0x1a0   : > { %v1197_v46 = vadd.f32 %v2025_v2, %v1110_v14 }
 0x1a1   : > { %1261 = vst.msk [vmem:[%s2032_s9 + $0x170] sm:$0xff] %vm1214_vm1, %v1196_v12 }
 0x1a2   : > { %1262 = vst.msk [vmem:[%s2032_s9 + $0x178] sm:$0xff] %vm1214_vm1, %v1197_v46  ;;  %v1048_v63 = vpop.xlane.xlu0 %1047 }
 0x1a3   : > { %v1050_v57 = vpop.xlane.xlu1 %1049  ;;  %v1166_v9 = vadd.f32 %v2025_v2, %v1048_v63 }
 0x1a4   : > { %v1167_v5 = vadd.f32 %v2025_v2, %v1050_v57 }
 0x1a5   : > { %1231 = vst.msk [vmem:[%s2032_s9 + $0x80] sm:$0xff] %vm1214_vm1, %v1166_v9 }
 0x1a6   : > { %1232 = vst.msk [vmem:[%s2032_s9 + $0x88] sm:$0xff] %vm1214_vm1, %v1167_v5  ;;  %v1112_v25 = vpop.xlane.xlu0 %1111 }
 0x1a7   : > { %v1114_v20 = vpop.xlane.xlu1 %1113  ;;  %v1198_v34 = vadd.f32 %v2025_v2, %v1112_v25 }
 0x1a8   : > { %v1199_v30 = vadd.f32 %v2025_v2, %v1114_v20 }
 0x1a9   : > { %1263 = vst.msk [vmem:[%s2032_s9 + $0x180] sm:$0xff] %vm1214_vm1, %v1198_v34 }
 0x1aa   : > { %1264 = vst.msk [vmem:[%s2032_s9 + $0x188] sm:$0xff] %vm1214_vm1, %v1199_v30  ;;  %v1052_v45 = vpop.xlane.xlu0 %1051 }
 0x1ab   : > { %v1054_v41 = vpop.xlane.xlu1 %1053  ;;  %v1168_v53 = vadd.f32 %v2025_v2, %v1052_v45 }
 0x1ac   : > { %v1169_v48 = vadd.f32 %v2025_v2, %v1054_v41 }
 0x1ad   : > { %1233 = vst.msk [vmem:[%s2032_s9 + $0x90] sm:$0xff] %vm1214_vm1, %v1168_v53 }
 0x1ae   : > { %1234 = vst.msk [vmem:[%s2032_s9 + $0x98] sm:$0xff] %vm1214_vm1, %v1169_v48  ;;  %v1116_v1 = vpop.xlane.xlu0 %1115 }
 0x1af   : > { %v1118_v61 = vpop.xlane.xlu1 %1117  ;;  %v1200_v21 = vadd.f32 %v2025_v2, %v1116_v1 }
 0x1b0   : > { %v1201_v11 = vadd.f32 %v2025_v2, %v1118_v61 }
 0x1b1   : > { %1265 = vst.msk [vmem:[%s2032_s9 + $0x190] sm:$0xff] %vm1214_vm1, %v1200_v21 }
 0x1b2   : > { %1266 = vst.msk [vmem:[%s2032_s9 + $0x198] sm:$0xff] %vm1214_vm1, %v1201_v11  ;;  %v1056_v33 = vpop.xlane.xlu0 %1055 }
 0x1b3   : > { %v1058_v29 = vpop.xlane.xlu1 %1057  ;;  %v1170_v42 = vadd.f32 %v2025_v2, %v1056_v33 }
 0x1b4   : > { %v1171_v37 = vadd.f32 %v2025_v2, %v1058_v29 }
 0x1b5   : > { %1235 = vst.msk [vmem:[%s2032_s9 + $0xa0] sm:$0xff] %vm1214_vm1, %v1170_v42 }
 0x1b6   : > { %1236 = vst.msk [vmem:[%s2032_s9 + $0xa8] sm:$0xff] %vm1214_vm1, %v1171_v37  ;;  %v1120_v50 = vpop.xlane.xlu0 %1119 }
 0x1b7   : > { %v1122_v47 = vpop.xlane.xlu1 %1121  ;;  %v1202_v52 = vadd.f32 %v2025_v2, %v1120_v50 }
 0x1b8   : > { %v1203_v51 = vadd.f32 %v2025_v2, %v1122_v47 }
 0x1b9   : > { %1267 = vst.msk [vmem:[%s2032_s9 + $0x1a0] sm:$0xff] %vm1214_vm1, %v1202_v52 }
 0x1ba   : > { %1268 = vst.msk [vmem:[%s2032_s9 + $0x1a8] sm:$0xff] %vm1214_vm1, %v1203_v51  ;;  %v1060_v55 = vpop.xlane.xlu0 %1059 }
 0x1bb   : > { %v1062_v54 = vpop.xlane.xlu1 %1061  ;;  %v1172_v56 = vadd.f32 %v2025_v2, %v1060_v55 }
 0x1bc   : > { %v1173_v27 = vadd.f32 %v2025_v2, %v1062_v54 }
 0x1bd   : > { %1237 = vst.msk [vmem:[%s2032_s9 + $0xb0] sm:$0xff] %vm1214_vm1, %v1172_v56 }
 0x1be   : > { %1238 = vst.msk [vmem:[%s2032_s9 + $0xb8] sm:$0xff] %vm1214_vm1, %v1173_v27  ;;  %v1124_v60 = vpop.xlane.xlu0 %1123 }
 0x1bf   : > { %v1126_v58 = vpop.xlane.xlu1 %1125  ;;  %v1204_v59 = vadd.f32 %v2025_v2, %v1124_v60 }
 0x1c0   : > { %v1205_v62 = vadd.f32 %v2025_v2, %v1126_v58 }
 0x1c1   : > { %1269 = vst.msk [vmem:[%s2032_s9 + $0x1b0] sm:$0xff] %vm1214_vm1, %v1204_v59 }
 0x1c2   : > { %1270 = vst.msk [vmem:[%s2032_s9 + $0x1b8] sm:$0xff] %vm1214_vm1, %v1205_v62  ;;  %v1064_v4 = vpop.xlane.xlu0 %1063 }
 0x1c3   : > { %v1066_v0 = vpop.xlane.xlu1 %1065  ;;  %v1174_v49 = vadd.f32 %v2025_v2, %v1064_v4 }
 0x1c4   : > { %v1175_v6 = vadd.f32 %v2025_v2, %v1066_v0 }
 0x1c5   : > { %1239 = vst.msk [vmem:[%s2032_s9 + $0xc0] sm:$0xff] %vm1214_vm1, %v1174_v49 }
 0x1c6   : > { %1240 = vst.msk [vmem:[%s2032_s9 + $0xc8] sm:$0xff] %vm1214_vm1, %v1175_v6  ;;  %v1128_v10 = vpop.xlane.xlu0 %1127 }
 0x1c7   : > { %v1130_v8 = vpop.xlane.xlu1 %1129  ;;  %v1206_v19 = vadd.f32 %v2025_v2, %v1128_v10 }
 0x1c8   : > { %v1207_v15 = vadd.f32 %v2025_v2, %v1130_v8 }
 0x1c9   : > { %1271 = vst.msk [vmem:[%s2032_s9 + $0x1c0] sm:$0xff] %vm1214_vm1, %v1206_v19 }
 0x1ca   : > { %1272 = vst.msk [vmem:[%s2032_s9 + $0x1c8] sm:$0xff] %vm1214_vm1, %v1207_v15  ;;  %v1068_v22 = vpop.xlane.xlu0 %1067 }
 0x1cb   : > { %v1070_v3 = vpop.xlane.xlu1 %1069  ;;  %v1176_v24 = vadd.f32 %v2025_v2, %v1068_v22 }
 0x1cc   : > { %v1177_v23 = vadd.f32 %v2025_v2, %v1070_v3 }
 0x1cd   : > { %1241 = vst.msk [vmem:[%s2032_s9 + $0xd0] sm:$0xff] %vm1214_vm1, %v1176_v24 }
 0x1ce   : > { %1242 = vst.msk [vmem:[%s2032_s9 + $0xd8] sm:$0xff] %vm1214_vm1, %v1177_v23  ;;  %v1132_v16 = vpop.xlane.xlu0 %1131 }
 0x1cf   : > { %v1134_v28 = vpop.xlane.xlu1 %1133  ;;  %v1208_v7 = vadd.f32 %v2025_v2, %v1132_v16 }
 0x1d0   : > { %v1209_v18 = vadd.f32 %v2025_v2, %v1134_v28 }
 0x1d1   : > { %1273 = vst.msk [vmem:[%s2032_s9 + $0x1d0] sm:$0xff] %vm1214_vm1, %v1208_v7 }
 0x1d2   : > { %1274 = vst.msk [vmem:[%s2032_s9 + $0x1d8] sm:$0xff] %vm1214_vm1, %v1209_v18  ;;  %v1072_v31 = vpop.xlane.xlu0 %1071 }
 0x1d3   : > { %v1074_v17 = vpop.xlane.xlu1 %1073  ;;  %v1178_v32 = vadd.f32 %v2025_v2, %v1072_v31 }
 0x1d4   : > { %v1179_v13 = vadd.f32 %v2025_v2, %v1074_v17 }
 0x1d5   : > { %1243 = vst.msk [vmem:[%s2032_s9 + $0xe0] sm:$0xff] %vm1214_vm1, %v1178_v32 }
 0x1d6   : > { %1244 = vst.msk [vmem:[%s2032_s9 + $0xe8] sm:$0xff] %vm1214_vm1, %v1179_v13  ;;  %v1136_v36 = vpop.xlane.xlu0 %1135 }
 0x1d7   : > { %v1138_v35 = vpop.xlane.xlu1 %1137  ;;  %v1210_v39 = vadd.f32 %v2025_v2, %v1136_v36 }
 0x1d8   : > { %v1211_v38 = vadd.f32 %v2025_v2, %v1138_v35 }
 0x1d9   : > { %1275 = vst.msk [vmem:[%s2032_s9 + $0x1e0] sm:$0xff] %vm1214_vm1, %v1210_v39 }
 0x1da   : > { %1276 = vst.msk [vmem:[%s2032_s9 + $0x1e8] sm:$0xff] %vm1214_vm1, %v1211_v38  ;;  %v1076_v40 = vpop.xlane.xlu0 %1075 }
 0x1db   : > { %v1078_v26 = vpop.xlane.xlu1 %1077  ;;  %v1180_v14 = vadd.f32 %v2025_v2, %v1076_v40 }
 0x1dc   : > { %v1181_v43 = vadd.f32 %v2025_v2, %v1078_v26 }
 0x1dd   : > { %1245 = vst.msk [vmem:[%s2032_s9 + $0xf0] sm:$0xff] %vm1214_vm1, %v1180_v14 }
 0x1de   : > { %1246 = vst.msk [vmem:[%s2032_s9 + $0xf8] sm:$0xff] %vm1214_vm1, %v1181_v43  ;;  %v1140_v46 = vpop.xlane.xlu0 %1139 }
 0x1df   : > { %v1142_v44 = vpop.xlane.xlu1 %1141  ;;  %v1212_v57 = vadd.f32 %v2025_v2, %v1140_v46 }
 0x1e0   : > { %v1213_v12 = vadd.f32 %v2025_v2, %v1142_v44 }
 0x1e1   : > { %1277 = vst.msk [vmem:[%s2032_s9 + $0x1f0] sm:$0xff] %vm1214_vm1, %v1212_v57 }
 0x1e2   : > { %1278 = vst.msk [vmem:[%s2032_s9 + $0x1f8] sm:$0xff] %vm1214_vm1, %v1213_v12 }
 0x1e3 PF: > { %s17_s20 = sadd.s32 1, %s1592_s20  }
 0x1e4   : > { %p14_p4 = scmp.ge.s32.totalorder %s17_s20, 4  }
 0x1e6   :  { %16 = sbr.rel (!%p14_p4) target bundleno = 3 (0x3), region = 70 }

</bundles_post_ra>
